<compile_context>
chip_gen: v7x
topology: tpu7x:2x2x1
jax: 0.10.0
libtpu: 0.0.40
codegen_flags: <defaults>
</compile_context>

<pallas_src>
import functools

import jax
import jax.numpy as jnp
from jax.experimental import pallas as pl
from jax.experimental.pallas import tpu as pltpu


# ----------------------------------------------------------------------------
# helpers
# ----------------------------------------------------------------------------

def _round_up(x, m):
    return ((x + m - 1) // m) * m


def _pad_to(x, mults):
    """Zero-pad each axis of x up to a multiple of mults[axis] (None = no pad)."""
    pads = []
    need = False
    for size, m in zip(x.shape, mults):
        p = 0 if m is None else (-size) % m
        pads.append((0, p))
        need = need or p > 0
    return jnp.pad(x, pads) if need else x


# ----------------------------------------------------------------------------
# Tiled linear (+ optional fused gelu_pytorch_tanh)
# ----------------------------------------------------------------------------

def _matmul_kernel(x_ref, w_ref, b_ref, o_ref, acc_ref, *, act):
    @pl.when(pl.program_id(2) == 0)
    def _():
        acc_ref[...] = jnp.zeros_like(acc_ref)

    # bf16 operands straight into the MXU, f32 accumulation.
    acc_ref[...] += jnp.dot(x_ref[...], w_ref[...],
                            preferred_element_type=jnp.float32)

    @pl.when(pl.program_id(2) == pl.num_programs(2) - 1)
    def _():
        y = acc_ref[...] + b_ref[...].astype(jnp.float32)
        if act == "gelu_pytorch_tanh":
            c = 0.7978845608028654  # sqrt(2/pi)
            y = 0.5 * y * (1.0 + jnp.tanh(c * (y + 0.044715 * y * y * y)))
        o_ref[...] = y.astype(o_ref.dtype)


def linear(x, w, b, act=None, *, tm=256, tn=512, tk=512):
    """x: (T, K) @ w: (K, N) + b: (1, N) -> (T, N)."""
    T, K = x.shape
    N = w.shape[1]
    tm = min(tm, _round_up(T, 8))
    tn = min(tn, _round_up(N, 128))
    tk = min(tk, _round_up(K, 128))
    xp = _pad_to(x, (tm, tk))
    wp = _pad_to(w, (tk, tn))
    bp = _pad_to(b, (None, tn))
    Mp, Kp = xp.shape
    Np = wp.shape[1]
    out = pl.pallas_call(
        functools.partial(_matmul_kernel, act=act),
        out_shape=jax.ShapeDtypeStruct((Mp, Np), x.dtype),
        grid=(Mp // tm, Np // tn, Kp // tk),
        in_specs=[
            pl.BlockSpec((tm, tk), lambda i, j, k: (i, k)),
            pl.BlockSpec((tk, tn), lambda i, j, k: (k, j)),
            pl.BlockSpec((1, tn), lambda i, j, k: (0, j)),
        ],
        out_specs=pl.BlockSpec((tm, tn), lambda i, j, k: (i, j)),
        scratch_shapes=[pltpu.VMEM((tm, tn), jnp.float32)],
        compiler_params=pltpu.CompilerParams(
            dimension_semantics=("parallel", "parallel", "arbitrary")),
    )(xp, wp, bp)
    return out[:T, :N]


# ----------------------------------------------------------------------------
# LayerNorm (plain, and fused residual-add + LayerNorm)
# ----------------------------------------------------------------------------

def _ln_kernel(x_ref, g_ref, b_ref, o_ref, *, eps):
    x = x_ref[...].astype(jnp.float32)
    mu = jnp.mean(x, axis=-1, keepdims=True)
    var = jnp.mean(jnp.square(x - mu), axis=-1, keepdims=True)
    y = (x - mu) * jax.lax.rsqrt(var + eps)
    y = y * g_ref[...].astype(jnp.float32) + b_ref[...].astype(jnp.float32)
    o_ref[...] = y.astype(o_ref.dtype)


def layernorm(x, gamma, beta, eps, *, tm=256):
    T, H = x.shape
    tm = min(tm, _round_up(T, 8))
    xp = _pad_to(x, (tm, None))
    Tp = xp.shape[0]
    out = pl.pallas_call(
        functools.partial(_ln_kernel, eps=eps),
        out_shape=jax.ShapeDtypeStruct((Tp, H), x.dtype),
        grid=(Tp // tm,),
        in_specs=[
            pl.BlockSpec((tm, H), lambda i: (i, 0)),
            pl.BlockSpec((1, H), lambda i: (0, 0)),
            pl.BlockSpec((1, H), lambda i: (0, 0)),
        ],
        out_specs=pl.BlockSpec((tm, H), lambda i: (i, 0)),
        compiler_params=pltpu.CompilerParams(dimension_semantics=("parallel",)),
    )(xp, gamma, beta)
    return out[:T]


def _add_ln_kernel(x_ref, r_ref, g_ref, b_ref, o_ref, s_ref, *, eps):
    s = x_ref[...].astype(jnp.float32) + r_ref[...].astype(jnp.float32)
    s_ref[...] = s.astype(s_ref.dtype)
    mu = jnp.mean(s, axis=-1, keepdims=True)
    var = jnp.mean(jnp.square(s - mu), axis=-1, keepdims=True)
    y = (s - mu) * jax.lax.rsqrt(var + eps)
    y = y * g_ref[...].astype(jnp.float32) + b_ref[...].astype(jnp.float32)
    o_ref[...] = y.astype(o_ref.dtype)


def add_layernorm(x, residual, gamma, beta, eps, *, tm=256):
    """Fused (x + residual) -> LayerNorm.  Returns (normed, x + residual)."""
    T, H = x.shape
    tm = min(tm, _round_up(T, 8))
    xp = _pad_to(x, (tm, None))
    rp = _pad_to(residual, (tm, None))
    Tp = xp.shape[0]
    normed, summed = pl.pallas_call(
        functools.partial(_add_ln_kernel, eps=eps),
        out_shape=(jax.ShapeDtypeStruct((Tp, H), x.dtype),
                   jax.ShapeDtypeStruct((Tp, H), x.dtype)),
        grid=(Tp // tm,),
        in_specs=[
            pl.BlockSpec((tm, H), lambda i: (i, 0)),
            pl.BlockSpec((tm, H), lambda i: (i, 0)),
            pl.BlockSpec((1, H), lambda i: (0, 0)),
            pl.BlockSpec((1, H), lambda i: (0, 0)),
        ],
        out_specs=(pl.BlockSpec((tm, H), lambda i: (i, 0)),
                   pl.BlockSpec((tm, H), lambda i: (i, 0))),
        compiler_params=pltpu.CompilerParams(dimension_semantics=("parallel",)),
    )(xp, rp, gamma, beta)
    return normed[:T], summed[:T]


# ----------------------------------------------------------------------------
# RoPE (neox style), applied once per head, hoisted out of the attention grid
# ----------------------------------------------------------------------------

def _rope_kernel(x_ref, cos_ref, sin_ref, o_ref):
    x = x_ref[0].astype(jnp.float32)         # (tm, D)
    cos = cos_ref[...].astype(jnp.float32)   # (tm, D//2)
    sin = sin_ref[...].astype(jnp.float32)
    d_half = cos.shape[-1]
    x1 = x[:, :d_half]
    x2 = x[:, d_half:]
    # neox: rotate_half(x) = [-x2, x1]
    o_ref[0] = jnp.concatenate(
        [x1 * cos - x2 * sin, x2 * cos + x1 * sin], axis=-1).astype(o_ref.dtype)


def apply_rope(x, cos, sin, *, tm=256):
    """x: (n_heads, T, D); cos/sin: (T, D//2)."""
    nh, T, D = x.shape
    tm = min(tm, _round_up(T, 8))
    xp = _pad_to(x, (None, tm, None))
    cp = _pad_to(cos, (tm, None))
    sp = _pad_to(sin, (tm, None))
    Tp = xp.shape[1]
    out = pl.pallas_call(
        _rope_kernel,
        out_shape=jax.ShapeDtypeStruct((nh, Tp, D), x.dtype),
        grid=(nh, Tp // tm),
        in_specs=[
            pl.BlockSpec((1, tm, D), lambda h, i: (h, i, 0)),
            pl.BlockSpec((tm, D // 2), lambda h, i: (i, 0)),
            pl.BlockSpec((tm, D // 2), lambda h, i: (i, 0)),
        ],
        out_specs=pl.BlockSpec((1, tm, D), lambda h, i: (h, i, 0)),
        compiler_params=pltpu.CompilerParams(
            dimension_semantics=("parallel", "parallel")),
    )(xp, cp, sp)
    return out[:, :T, :]


# ----------------------------------------------------------------------------
# Flash attention with causal + sliding-window mask and windowed kv tile span
# ----------------------------------------------------------------------------

_NEG_INF = -1e30


def _flash_attn_kernel(q_ref, k_ref, v_ref, o_ref, m_sc, l_sc, acc_sc, *,
                       scale, window, tile, span):
    qi = pl.program_id(1)
    j = pl.program_id(2)
    ki = qi - (span - 1) + j          # actual kv tile index; < 0 => skipped

    @pl.when(j == 0)
    def _():
        m_sc[...] = jnp.full_like(m_sc, _NEG_INF)
        l_sc[...] = jnp.zeros_like(l_sc)
        acc_sc[...] = jnp.zeros_like(acc_sc)

    @pl.when(ki >= 0)
    def _():
        q = q_ref[0]                  # (tile, D) bf16
        k = k_ref[0]                  # (tile, D) bf16
        s = jax.lax.dot_general(q, k, (((1,), (1,)), ((), ())),
                                preferred_element_type=jnp.float32) * scale
        row = qi * tile + jax.lax.broadcasted_iota(jnp.int32, (tile, tile), 0)
        col = ki * tile + jax.lax.broadcasted_iota(jnp.int32, (tile, tile), 1)
        mask = (col <= row) & ((row - col) < window)
        s = jnp.where(mask, s, _NEG_INF)

        m_prev = m_sc[...]
        m_new = jnp.maximum(m_prev, jnp.max(s, axis=-1, keepdims=True))
        alpha = jnp.exp(m_prev - m_new)
        p = jnp.where(mask, jnp.exp(s - m_new), 0.0)   # explicit zero for masked cols
        l_sc[...] = alpha * l_sc[...] + jnp.sum(p, axis=-1, keepdims=True)
        acc_sc[...] = alpha * acc_sc[...] + jnp.dot(
            p.astype(v_ref.dtype), v_ref[0], preferred_element_type=jnp.float32)
        m_sc[...] = m_new

    @pl.when(j == pl.num_programs(2) - 1)
    def _():
        inv_l = pl.reciprocal(l_sc[...], approx=True)
        o_ref[0] = (acc_sc[...] * inv_l).astype(o_ref.dtype)


def flash_attention(q, k, v, sliding_window, *, tile=128):
    """q: (H, T, D); k, v: (KVH, T, D) -> (H, T, D).  Causal + sliding window."""
    H, T, D = q.shape
    KVH = k.shape[0]
    group = H // KVH
    scale = float(D) ** -0.5
    tile = min(tile, _round_up(T, 8))
    qp = _pad_to(q, (None, tile, None))
    kp = _pad_to(k, (None, tile, None))
    vp = _pad_to(v, (None, tile, None))
    Tp = qp.shape[1]
    nq = Tp // tile
    window = int(sliding_window) if sliding_window is not None else Tp
    # number of kv tiles that can intersect the causal + sliding window of a q tile
    span = min(nq, (window + tile - 2) // tile + 1)

    def q_map(h, qi, j):
        return (h, qi, 0)

    def kv_map(h, qi, j):
        return (h // group, jnp.maximum(qi - (span - 1) + j, 0), 0)

    out = pl.pallas_call(
        functools.partial(_flash_attn_kernel, scale=scale, window=window,
                          tile=tile, span=span),
        out_shape=jax.ShapeDtypeStruct((H, Tp, D), q.dtype),
        grid=(H, nq, span),
        in_specs=[
            pl.BlockSpec((1, tile, D), q_map),
            pl.BlockSpec((1, tile, D), kv_map),
            pl.BlockSpec((1, tile, D), kv_map),
        ],
        out_specs=pl.BlockSpec((1, tile, D), q_map),
        scratch_shapes=[
            pltpu.VMEM((tile, 1), jnp.float32),   # running max
            pltpu.VMEM((tile, 1), jnp.float32),   # running denom
            pltpu.VMEM((tile, D), jnp.float32),   # output accumulator
        ],
        compiler_params=pltpu.CompilerParams(
            dimension_semantics=("parallel", "parallel", "arbitrary")),
    )(qp, kp, vp)
    return out[:, :T, :]


# ----------------------------------------------------------------------------
# Model glue (plain JAX)
# ----------------------------------------------------------------------------

def decoder_layer(h, residual, p, cos, sin, cfg):
    T = h.shape[0]
    nH, nKV, D = cfg["num_heads"], cfg["num_kv_heads"], cfg["head_dim"]
    q_size, kv_size = nH * D, nKV * D
    eps = cfg["norm_epsilon"]

    # ---- self-attention block ----
    if residual is None:
        residual = h
        x = layernorm(h, p["ln1_g"], p["ln1_b"], eps)
    else:
        x, residual = add_layernorm(h, residual, p["ln1_g"], p["ln1_b"], eps)

    qkv = linear(x, p["qkv_w"], p["qkv_b"])
    q = qkv[:, :q_size].reshape(T, nH, D).transpose(1, 0, 2)                 # (H, T, D)
    k = qkv[:, q_size:q_size + kv_size].reshape(T, nKV, D).transpose(1, 0, 2)
    v = qkv[:, q_size + kv_size:].reshape(T, nKV, D).transpose(1, 0, 2)
    q = apply_rope(q, cos, sin)
    k = apply_rope(k, cos, sin)
    attn = flash_attention(q, k, v, cfg["sliding_window"],
                           tile=cfg.get("attn_tile", 128))
    attn = attn.transpose(1, 0, 2).reshape(T, q_size)
    attn = linear(attn, p["o_w"], p["o_b"])

    # ---- MLP block (residual add fused into the LayerNorm kernel) ----
    x, residual = add_layernorm(attn, residual, p["ln2_g"], p["ln2_b"], eps)
    x = linear(x, p["fc_w"], p["fc_b"], act="gelu_pytorch_tanh")
    x = linear(x, p["proj_w"], p["proj_b"])
    return x, residual


def starcoder2_forward(params, input_ids, positions, kv_caches, cfg):
    # TODO(synk): kv_caches ignored — prefill-only semantics (no paged cache write / decode).
    del kv_caches
    h = jnp.take(params["embed"], input_ids, axis=0)                # (T, hidden) bf16

    D = cfg["head_dim"]
    inv_freq = 1.0 / (cfg["rope_theta"] **
                      (jnp.arange(0, D, 2, dtype=jnp.float32) / D))
    ang = positions.astype(jnp.float32)[:, None] * inv_freq[None, :]  # (T, D/2)
    cos, sin = jnp.cos(ang), jnp.sin(ang)

    residual = None
    for lp in params["layers"]:
        h, residual = decoder_layer(h, residual, lp, cos, sin, cfg)

    # final residual add + model-level LayerNorm (fused)
    h, _ = add_layernorm(h, residual, params["norm_g"], params["norm_b"],
                         cfg["norm_epsilon"])
    return h


def init_params(key, cfg):
    H, I = cfg["hidden_size"], cfg["intermediate_size"]
    q_size = cfg["num_heads"] * cfg["head_dim"]
    kv_size = cfg["num_kv_heads"] * cfg["head_dim"]
    dtype = jnp.bfloat16

    def w(k, shape, std=0.02):
        return (std * jax.random.normal(k, shape, dtype=jnp.float32)).astype(dtype)

    keys = jax.random.split(key, 1 + cfg["num_hidden_layers"])
    params = {
        "embed": w(keys[0], (cfg["vocab_size"], H)),
        "norm_g": jnp.ones((1, H), jnp.float32),
        "norm_b": jnp.zeros((1, H), jnp.float32),
        "layers": [],
    }
    for li in range(cfg["num_hidden_layers"]):
        ks = jax.random.split(keys[1 + li], 8)
        params["layers"].append({
            "qkv_w": w(ks[0], (H, q_size + 2 * kv_size)),
            "qkv_b": w(ks[1], (1, q_size + 2 * kv_size), std=0.01),
            "o_w": w(ks[2], (q_size, H)),
            "o_b": w(ks[3], (1, H), std=0.01),
            "fc_w": w(ks[4], (H, I)),
            "fc_b": w(ks[5], (1, I), std=0.01),
            "proj_w": w(ks[6], (I, H)),
            "proj_b": w(ks[7], (1, H), std=0.01),
            "ln1_g": jnp.ones((1, H), jnp.float32),
            "ln1_b": jnp.zeros((1, H), jnp.float32),
            "ln2_g": jnp.ones((1, H), jnp.float32),
            "ln2_b": jnp.zeros((1, H), jnp.float32),
        })
    return params


if __name__ == "__main__":
    # Small smoke-test config (real Starcoder2: hidden=6144, head_dim=128,
    # sliding_window=4096 — the default tiles tm=256/tn=512/tk=512, attn tile 128
    # then kick in; here we shrink the attention tile so the windowed flash grid,
    # kv-tile skipping and multi-tile accumulation are all exercised).
    cfg = dict(
        vocab_size=256,
        hidden_size=64,
        intermediate_size=128,
        num_hidden_layers=2,
        num_heads=4,
        num_kv_heads=2,       # GQA
        head_dim=16,          # hidden_size // num_heads
        norm_epsilon=1e-5,
        rope_theta=10000.0,
        sliding_window=12,
        attn_tile=8,
    )

    key = jax.random.PRNGKey(0)
    pkey, dkey = jax.random.split(key)
    params = init_params(pkey, cfg)

    T = 32
    input_ids = jax.random.randint(dkey, (T,), 0, cfg["vocab_size"], dtype=jnp.int32)
    positions = jnp.arange(T, dtype=jnp.int32)
    kv_caches = [None] * cfg["num_hidden_layers"]

    hidden_states = starcoder2_forward(params, input_ids, positions, kv_caches, cfg)
    jax.block_until_ready(hidden_states)
    assert hidden_states.shape == (T, cfg["hidden_size"])
    assert bool(jnp.all(jnp.isfinite(hidden_states.astype(jnp.float32))))
    print("KERNEL_OK")
</pallas_src>

<mosaic_0001>
module attributes {stable_mosaic.version = 11 : i64} {
  func.func @_ln_kernel(%arg0: i32, %arg1: memref<32x64xbf16, #tpu.memory_space<vmem>>, %arg2: memref<1x64xf32, #tpu.memory_space<vmem>>, %arg3: memref<1x64xf32, #tpu.memory_space<vmem>>, %arg4: memref<32x64xbf16, #tpu.memory_space<vmem>>) attributes {dimension_semantics = [#tpu.dimension_semantics<parallel>], iteration_bounds = array<i64: 1>, scalar_prefetch = 0 : i64, scratch_operands = 0 : i64, tpu.core_type = #tpu.core_type<tc>, window_params = [{transform_indices = @transform_0, window_bounds = array<i64: 32, 64>}, {pipeline_mode = #tpu.pipeline_mode<synchronous>, transform_indices = @transform_1, window_bounds = array<i64: 1, 64>}, {pipeline_mode = #tpu.pipeline_mode<synchronous>, transform_indices = @transform_2, window_bounds = array<i64: 1, 64>}, {transform_indices = @transform_3, window_bounds = array<i64: 32, 64>}]} {
    %c0 = arith.constant 0 : index
    %c0_0 = arith.constant 0 : index
    %0 = vector.load %arg1[%c0, %c0_0] : memref<32x64xbf16, #tpu.memory_space<vmem>>, vector<32x64xbf16>
    %1 = arith.extf %0 : vector<32x64xbf16> to vector<32x64xf32>
    %cst = arith.constant dense<0.000000e+00> : vector<32xf32>
    %2 = vector.multi_reduction <add>, %1, %cst [1] : vector<32x64xf32> to vector<32xf32>
    %3 = vector.shape_cast %2 : vector<32xf32> to vector<32x1xf32>
    %cst_1 = arith.constant 6.400000e+01 : f32
    %4 = vector.broadcast %cst_1 : f32 to vector<32x1xf32>
    %5 = arith.divf %3, %4 : vector<32x1xf32>
    %6 = vector.broadcast %5 : vector<32x1xf32> to vector<32x64xf32>
    %7 = arith.subf %1, %6 : vector<32x64xf32>
    %8 = arith.mulf %7, %7 : vector<32x64xf32>
    %cst_2 = arith.constant dense<0.000000e+00> : vector<32xf32>
    %9 = vector.multi_reduction <add>, %8, %cst_2 [1] : vector<32x64xf32> to vector<32xf32>
    %10 = vector.shape_cast %9 : vector<32xf32> to vector<32x1xf32>
    %cst_3 = arith.constant 6.400000e+01 : f32
    %11 = vector.broadcast %cst_3 : f32 to vector<32x1xf32>
    %12 = arith.divf %10, %11 : vector<32x1xf32>
    %13 = vector.broadcast %5 : vector<32x1xf32> to vector<32x64xf32>
    %14 = arith.subf %1, %13 : vector<32x64xf32>
    %cst_4 = arith.constant 9.99999974E-6 : f32
    %15 = vector.broadcast %cst_4 : f32 to vector<32x1xf32>
    %16 = arith.addf %12, %15 : vector<32x1xf32>
    %17 = math.rsqrt %16 : vector<32x1xf32>
    %18 = vector.broadcast %17 : vector<32x1xf32> to vector<32x64xf32>
    %19 = arith.mulf %14, %18 : vector<32x64xf32>
    %c0_5 = arith.constant 0 : index
    %c0_6 = arith.constant 0 : index
    %20 = vector.load %arg2[%c0_5, %c0_6] : memref<1x64xf32, #tpu.memory_space<vmem>>, vector<1x64xf32>
    %21 = vector.broadcast %20 : vector<1x64xf32> to vector<32x64xf32>
    %22 = arith.mulf %19, %21 : vector<32x64xf32>
    %c0_7 = arith.constant 0 : index
    %c0_8 = arith.constant 0 : index
    %23 = vector.load %arg3[%c0_7, %c0_8] : memref<1x64xf32, #tpu.memory_space<vmem>>, vector<1x64xf32>
    %24 = vector.broadcast %23 : vector<1x64xf32> to vector<32x64xf32>
    %25 = arith.addf %22, %24 : vector<32x64xf32>
    %26 = arith.truncf %25 : vector<32x64xf32> to vector<32x64xbf16>
    %c0_9 = arith.constant 0 : index
    %c0_10 = arith.constant 0 : index
    %27 = vector.load %arg4[%c0_9, %c0_10] : memref<32x64xbf16, #tpu.memory_space<vmem>>, vector<32x64xbf16>
    tpu.vector_store %arg4[%c0_9, %c0_10], %26 {strides = array<i32>} : memref<32x64xbf16, #tpu.memory_space<vmem>>, vector<32x64xbf16>,
    return
  }
  func.func @transform_0(%arg0: i32) -> (i32, i32) {
    %c0_i32 = arith.constant 0 : i32
    %c0_i32_0 = arith.constant 0 : i32
    return %arg0, %c0_i32 : i32, i32
  }
  func.func @transform_1(%arg0: i32) -> (i32, i32) {
    %c0_i32 = arith.constant 0 : i32
    %c0_i32_0 = arith.constant 0 : i32
    %c0_i32_1 = arith.constant 0 : i32
    return %c0_i32, %c0_i32_0 : i32, i32
  }
  func.func @transform_2(%arg0: i32) -> (i32, i32) {
    %c0_i32 = arith.constant 0 : i32
    %c0_i32_0 = arith.constant 0 : i32
    %c0_i32_1 = arith.constant 0 : i32
    return %c0_i32, %c0_i32_0 : i32, i32
  }
  func.func @transform_3(%arg0: i32) -> (i32, i32) {
    %c0_i32 = arith.constant 0 : i32
    %c0_i32_0 = arith.constant 0 : i32
    return %arg0, %c0_i32 : i32, i32
  }
}

</mosaic_0001>

<bundles_post_ra>
// kernel: tpu_custom_call.1
= control target key start
LH: loop header
LB: loop body
LE: loop exit
PB: predicated region body
PF: predicated region fallthrough
CT: control target
= control target key end

     0   :  { %8 = vsyncpa [#allocation3], 0  ;;  %s302_s0 = inlined_call_operand.hbm [shape: bf16[32,64], index: 0, kind: input, shape index: {}]   ;;  %s303_s1 = inlined_call_operand.vmem [shape: f32[1,64], index: 1, kind: input, shape index: {}]   ;;  %s304_s2 = inlined_call_operand.vmem [shape: f32[1,64], index: 2, kind: input, shape index: {}]   ;;  %s305_s3 = inlined_call_operand.hbm [shape: bf16[32,64], index: 3, kind: output, shape index: {}]  }
   0x1   :  { %9 = vsyncpa [#allocation4], 0  ;;  %s230_s12 = smov [#allocation2]   ;;  %s182_s16 = scalar_lea.hbm %s302_s0, 256 }
   0x2   :  { %s15_s13 = sshll.u32 %s230_s12, 4  ;;  %p183_p0 = scmp.ne.s32.totalorder %s302_s0, %s182_s16  ;;  %s16_s13 = int_to_ptr.vmem [resolvable:$true] %s15_s13 }
   0x3   :  { %p186_p1 = scmp.lt.u32.totalorder %s182_s16, %s302_s0 }
   0x5   :  { %p188_p2 = pnand %p186_p1, %p183_p0 }
   0x7   :  { %191 = shalt.err (!%p188_p2)
}
   0x8   :  { %s192_s21 = scalar_lea.vmem %s16_s13, 256  ;;  %p197_p4 = scmp.lt.s32.totalorder %s16_s13, %s16_s13 }
   0x9   :  { %p193_p3 = scmp.ne.s32.totalorder %s16_s13, %s192_s21  ;;  %p198_p5 = scmp.lt.s32.totalorder %s192_s21, %s192_s21 }
   0xb   :  { %p199_p6 = por %p198_p5, %p197_p4 }
   0xd   :  { %p200_p7 = pnand %p199_p6, %p193_p3 }
   0xf   :  { %203 = shalt.err (!%p200_p7)
}
  0x10   :  { %s231_s22 = smov 64   ;;  %s232_s23 = smov 4  }
  0x11   :  { %21 = dma.hbm_to_vmem [thread:$0]  %s302_s0, 256, %s16_s13, [#allocation3], %s231_s22, %s231_s22, %s232_s23  }
  0x12   :  { %226 = dma.done.wait [#allocation3], 256  }
  0x13   :  { %227 = vsyncadd [#allocation3], 4294967040  ;;  %v162_v0 = vld [vmem:[#allocation2] sm:$0xff]   ;;  %vm37_vm0 = vcmask 523264   ;;  %v169_v1 = vld [vmem:[#allocation2 + $0x8] sm:$0xff]   ;;  %vm129_vm1 = vcmask 519168  }
  0x14   :  { %v163_v2 = vunpack.c.l.bf16 %v162_v0  ;;  %v167_v3 = vunpack.c.l.bf16 %v169_v1  ;;  %v164_v4 = vunpack.c.h.bf16 %v162_v0  ;;  %v168_v5 = vunpack.c.h.bf16 %v169_v1  ;;  %v151_v43 = vld [vmem:[%s303_s1] ss:$0 sm:$0xff]  ;;  %s233_s1 = smov [#allocation5]  }
  0x15   :  { %v152_v45 = vld [vmem:[%s304_s2] ss:$0 sm:$0xff]  ;;  %s139_s2 = sshll.u32 %s233_s1, 4  ;;  %s140_s2 = int_to_ptr.vmem [resolvable:$true] %s139_s2 }
  0x16   :  { %v38_v6 = vsel %vm37_vm0, %v163_v2, 0.0  ;;  %v44_v7 = vsel %vm37_vm0, %v167_v3, 0.0  ;;  %v41_v8 = vsel %vm37_vm0, %v164_v4, 0.0  ;;  %v47_v9 = vsel %vm37_vm0, %v168_v5, 0.0  ;;  %s204_s29 = scalar_lea.vmem %s140_s2, 256  ;;  %p209_p9 = scmp.lt.s32.totalorder %s140_s2, %s140_s2 }
  0x17   :  { %39 = vadd.xlane.f32.xlu0 %v38_v6  ;;  %45 = vadd.xlane.f32.xlu1 %v44_v7  ;;  %p205_p8 = scmp.ne.s32.totalorder %s140_s2, %s204_s29  ;;  %p210_p10 = scmp.lt.s32.totalorder %s204_s29, %s204_s29 }
  0x19   :  { %p211_p11 = por %p210_p10, %p209_p9 }
  0x1b   :  { %42 = vadd.xlane.f32.xlu0 %v41_v8  ;;  %48 = vadd.xlane.f32.xlu1 %v47_v9  ;;  %p212_p12 = pnand %p211_p11, %p205_p8 }
  0xa4   :  { %v40_v10 = vpop.xlane.xlu0 %39  ;;  %v46_v11 = vpop.xlane.xlu1 %45 }
  0xa5   :  { %v51_v12 = vmul.f32 0.015625, %v40_v10  ;;  %v53_v13 = vmul.f32 0.015625, %v46_v11 }
  0xa7   :  { %v55_v14 = vsub.f32 %v163_v2, %v51_v12  ;;  %v57_v15 = vsub.f32 %v167_v3, %v53_v13 }
  0xa8   :  { %v43_v16 = vpop.xlane.xlu0 %42  ;;  %v49_v17 = vpop.xlane.xlu1 %48 }
  0xa9   :  { %v52_v18 = vmul.f32 0.015625, %v43_v16  ;;  %v54_v19 = vmul.f32 0.015625, %v49_v17  ;;  %v59_v20 = vmul.f32 %v55_v14, %v55_v14  ;;  %v61_v21 = vmul.f32 %v57_v15, %v57_v15 }
  0xab   :  { %v56_v22 = vsub.f32 %v164_v4, %v52_v18  ;;  %v58_v23 = vsub.f32 %v168_v5, %v54_v19  ;;  %v63_v24 = vsel %vm37_vm0, %v59_v20, 0.0  ;;  %v69_v25 = vsel %vm37_vm0, %v61_v21, 0.0 }
  0xac   :  { %64 = vadd.xlane.f32.xlu0 %v63_v24 }
  0xad   :  { %v60_v26 = vmul.f32 %v56_v22, %v56_v22  ;;  %v62_v27 = vmul.f32 %v58_v23, %v58_v23 }
  0xaf   :  { %v66_v28 = vsel %vm37_vm0, %v60_v26, 0.0  ;;  %v72_v29 = vsel %vm37_vm0, %v62_v27, 0.0 }
  0xb0   :  { %70 = vadd.xlane.f32.xlu0 %v69_v25  ;;  %67 = vadd.xlane.f32.xlu1 %v66_v28 }
  0xb4   :  { %73 = vadd.xlane.f32.xlu1 %v72_v29 }
 0x139   :  { %v65_v30 = vpop.xlane.xlu0 %64 }
 0x13a   :  { %v75_v31 = vmul.f32 0.015625, %v65_v30 }
 0x13c   :  { %v79_v32 = vadd.f32 1e-05, %v75_v31 }
 0x13d   :  { %v68_v33 = vpop.xlane.xlu1 %67  ;;  %v71_v34 = vpop.xlane.xlu0 %70 }
 0x13e   :  { %174 = vrsqrt.f32 %v79_v32  ;;  %v76_v35 = vmul.f32 0.015625, %v68_v33  ;;  %v77_v36 = vmul.f32 0.015625, %v71_v34 }
 0x140   :  { %v80_v37 = vadd.f32 1e-05, %v76_v35  ;;  %v81_v38 = vadd.f32 1e-05, %v77_v36 }
 0x141   :  { %v74_v39 = vpop.xlane.xlu1 %73 }
 0x142   :  { %176 = vrsqrt.f32 %v80_v37  ;;  %v78_v40 = vmul.f32 0.015625, %v74_v39 }
 0x143   :  { %178 = vrsqrt.f32 %v81_v38 }
 0x144   :  { %v82_v41 = vadd.f32 1e-05, %v78_v40 }
 0x146   :  { %180 = vrsqrt.f32 %v82_v41 }
 0x148   :  { %v175_v42 = vpop.eup %174 }
 0x149   :  { %v87_v44 = vmul.f32 %v175_v42, %v55_v14 }
 0x14b   :  { %v98_v46 = vmul.f32 %v151_v43, %v87_v44 }
 0x14c   :  { %v177_v47 = vpop.eup %176 }
 0x14d   :  { %v179_v48 = vpop.eup %178  ;;  %v88_v49 = vmul.f32 %v177_v47, %v56_v22  ;;  %v109_v50 = vadd.f32 %v152_v45, %v98_v46 }
 0x14e   :  { %v89_v51 = vmul.f32 %v179_v48, %v57_v15 }
 0x14f   :  { %v99_v52 = vmul.f32 %v151_v43, %v88_v49  ;;  %v157_v53 = vpack.c.bf16 %v109_v50, %v109_v50 }
 0x150   :  { %v181_v54 = vpop.eup %180  ;;  %v100_v55 = vmul.f32 %v151_v43, %v89_v51 }
 0x151   :  { %v90_v56 = vmul.f32 %v181_v54, %v58_v23  ;;  %v110_v57 = vadd.f32 %v152_v45, %v99_v52  ;;  %130 = vst.msk [vmem:[#allocation5] sm:$0xf] %vm129_vm1, %v157_v53 }
 0x152   :  { %v111_v58 = vadd.f32 %v152_v45, %v100_v55 }
 0x153   :  { %v101_v59 = vmul.f32 %v151_v43, %v90_v56  ;;  %v158_v60 = vpack.c.bf16 %v110_v57, %v110_v57 }
 0x154   :  { %v159_v61 = vpack.c.bf16 %v111_v58, %v111_v58 }
 0x155   :  { %v112_v62 = vadd.f32 %v152_v45, %v101_v59  ;;  %131 = vst.msk [vmem:[#allocation5 + $0x4] sm:$0xf] %vm129_vm1, %v158_v60 }
 0x156   :  { %132 = vst.msk [vmem:[#allocation5 + $0x8] sm:$0xf] %vm129_vm1, %v159_v61 }
 0x157   :  { %v160_v63 = vpack.c.bf16 %v112_v62, %v112_v62 }
 0x159   :  { %133 = vst.msk [vmem:[#allocation5 + $0xc] sm:$0xf] %vm129_vm1, %v160_v63 }
 0x15a   :  { %215 = shalt.err (!%p212_p12)
}
 0x15b   :  { %s216_s5 = scalar_lea.hbm %s305_s3, 256 }
 0x15c   :  { %p217_p13 = scmp.ne.s32.totalorder %s305_s3, %s216_s5  ;;  %p220_p0 = scmp.lt.u32.totalorder %s216_s5, %s305_s3 }
 0x15e   :  { %p222_p1 = pnand %p220_p0, %p217_p13 }
 0x160   :  { %225 = shalt.err (!%p222_p1)
}
 0x161   :  { %145 = dma.vmem_to_hbm [thread:$0]  %s140_s2, 256, %s305_s3, [#allocation4], %s231_s22, %s231_s22, %s232_s23  }
 0x162   :  { %228 = dma.done.wait [#allocation4], 256  }
 0x163   :  { %229 = vsyncadd [#allocation4], 4294967040 }
 0x164   :  { %149 = vsyncpa [#allocation3], 1 }
 0x165   :  { %150 = vsyncpa [#allocation4], 1 }

</bundles_post_ra>
